<compile_context>
chip_gen: v7x
topology: tpu7x:2x2x1
jax: 0.10.0
libtpu: 0.0.40
codegen_flags: <defaults>
</compile_context>

<pallas_src>
import functools

import jax
import jax.numpy as jnp
from jax.experimental import pallas as pl
from jax.experimental.pallas import tpu as pltpu

_MIB = 1024 * 1024


def _layernorm_kernel(x_ref, a_ref, b_ref, o_ref, *, eps, feat):
    """Unpacked path: block is (tr, D); per-row moments via XLU reductions."""
    x = x_ref[...].astype(jnp.float32)
    s1 = jnp.sum(x, axis=-1, keepdims=True)
    s2 = jnp.sum(x * x, axis=-1, keepdims=True)
    mean = s1 * (1.0 / feat)
    # Unbiased variance (torch.std default).  One-pass form; clamp tiny
    # negative rounding residue before sqrt.
    var = jnp.maximum((s2 - s1 * mean) * (1.0 / (feat - 1)), 0.0)
    std = jnp.sqrt(var)
    inv = pl.reciprocal(std + eps, approx=False)   # exact: keep module numerics
    a = a_ref[...].astype(jnp.float32)             # (1, D), broadcast over rows
    b = b_ref[...].astype(jnp.float32)
    o_ref[...] = (a * ((x - mean) * inv) + b).astype(o_ref.dtype)


def _layernorm_packed_kernel(x_ref, a_ref, b_ref, seg_ref, o_ref, *, eps, feat):
    """Lane-packed path: block is (tr, L) with L = P*feat = 128.

    Each 128-lane row holds P independent logical rows of width `feat`.
    Segmented sums are computed (and simultaneously broadcast back to every
    lane of the segment) with one (tr,L)x(L,L) matmul against a block-diagonal
    ones matrix — negligible MXU work for an HBM-bound kernel.
    """
    x = x_ref[...].astype(jnp.float32)
    seg = seg_ref[...]                                             # (L, L) f32
    s1 = jnp.dot(x, seg, preferred_element_type=jnp.float32)       # seg-sum, bcast
    s2 = jnp.dot(x * x, seg, preferred_element_type=jnp.float32)
    mean = s1 * (1.0 / feat)
    var = jnp.maximum((s2 - s1 * mean) * (1.0 / (feat - 1)), 0.0)
    std = jnp.sqrt(var)
    inv = pl.reciprocal(std + eps, approx=False)
    a = a_ref[...].astype(jnp.float32)             # (1, L) params tiled P times
    b = b_ref[...].astype(jnp.float32)
    o_ref[...] = (a * ((x - mean) * inv) + b).astype(o_ref.dtype)


def _pick_rows_tile(n_rows, row_bytes, itemsize, target_bytes):
    """Pick a row-tile size from a byte budget, dtype-aware sublane alignment."""
    sub = max(8, 32 // itemsize)                   # 8 f32 / 16 bf16 / 32 int8-fp8
    tr = max(1, target_bytes // max(1, row_bytes))
    if tr < n_rows:
        tr = (tr // sub) * sub
        if tr < sub:
            tr = sub                               # minimum legal aligned tile
    if tr >= n_rows:
        if n_rows >= 2 * sub:
            # Keep at least 2 grid blocks so v7x's two TensorCores both get
            # work (no-op on single-TC v5e/v6e).
            half = (n_rows + 1) // 2
            tr = ((half + sub - 1) // sub) * sub
            if tr >= n_rows:
                tr = n_rows
        else:
            tr = n_rows                            # full extent is always legal
    return tr, sub


def layer_norm(x, a_2, b_2, *, eps=1e-6, target_block_bytes=4 * _MIB):
    """x: (..., D). a_2, b_2: (D,) scale/shift. Returns same shape/dtype as x."""
    orig_shape = x.shape
    D = orig_shape[-1]
    rows = 1
    for s in orig_shape[:-1]:
        rows *= int(s)

    itemsize = x.dtype.itemsize
    x2 = x.reshape(rows, D)

    # --- small-D lane packing -------------------------------------------------
    pack = (D < 128) and (128 % D == 0) and D > 1
    if pack:
        P = 128 // D
        L = P * D                                  # = 128 (lane-dense)
        rows_pad = pl.cdiv(rows, P) * P
        if rows_pad != rows:
            x2 = jnp.concatenate(
                [x2, jnp.zeros((rows_pad - rows, D), x.dtype)], axis=0)
        xk = x2.reshape(rows_pad // P, L)
        ak = jnp.tile(a_2.reshape(-1), P).reshape(1, L)
        bk = jnp.tile(b_2.reshape(-1), P).reshape(1, L)
        lane = jnp.arange(L)
        seg = (lane[:, None] // D == lane[None, :] // D).astype(jnp.float32)
        n_rows = rows_pad // P
    else:
        P = 1
        L = D
        xk = x2
        ak = a_2.reshape(1, D)
        bk = b_2.reshape(1, D)
        n_rows = rows

    # --- tile sizing -----------------------------------------------------------
    row_bytes = L * itemsize
    tr, _sub = _pick_rows_tile(n_rows, row_bytes, itemsize, target_block_bytes)
    grid = (pl.cdiv(n_rows, tr),)

    # Scoped-VMEM budget: in + out blocks, double-buffered, plus headroom.
    # Stays within v7x's 64 MiB physical VMEM; raises v5e's 16 MiB default.
    block_bytes = tr * L * itemsize
    vmem_limit = int(min(max(32 * _MIB, 4 * block_bytes + 4 * _MIB), 56 * _MIB))

    cost = pl.CostEstimate(
        flops=9 * rows * D,
        transcendentals=2 * rows,                  # sqrt + reciprocal per row
        bytes_accessed=2 * rows * D * itemsize + 2 * D * 4,
    )

    common = dict(
        out_shape=jax.ShapeDtypeStruct((n_rows, L), x.dtype),
        compiler_params=pltpu.CompilerParams(
            dimension_semantics=("parallel",),     # megacore-shardable on v7x
            vmem_limit_bytes=vmem_limit,
        ),
        cost_estimate=cost,
    )

    # NOTE: a partial last grid block computes on padded/garbage rows; each row
    # is independent and the padded stores are masked, so this is safe.
    if pack:
        kernel = functools.partial(_layernorm_packed_kernel, eps=eps, feat=D)
        out = pl.pallas_call(
            kernel,
            grid_spec=pltpu.PrefetchScalarGridSpec(
                num_scalar_prefetch=0,
                grid=grid,
                in_specs=[
                    pl.BlockSpec((tr, L), lambda i: (i, 0)),   # x (row tile)
                    pl.BlockSpec((1, L), lambda i: (0, 0)),    # a_2 (invariant)
                    pl.BlockSpec((1, L), lambda i: (0, 0)),    # b_2 (invariant)
                    pl.BlockSpec((L, L), lambda i: (0, 0)),    # segment matrix
                ],
                out_specs=pl.BlockSpec((tr, L), lambda i: (i, 0)),
            ),
            **common,
        )(xk, ak, bk, seg)
        out = out.reshape(n_rows * P, D)[:rows]
    else:
        kernel = functools.partial(_layernorm_kernel, eps=eps, feat=D)
        out = pl.pallas_call(
            kernel,
            grid_spec=pltpu.PrefetchScalarGridSpec(
                num_scalar_prefetch=0,
                grid=grid,
                in_specs=[
                    pl.BlockSpec((tr, L), lambda i: (i, 0)),   # x (row tile)
                    pl.BlockSpec((1, L), lambda i: (0, 0)),    # a_2 (invariant)
                    pl.BlockSpec((1, L), lambda i: (0, 0)),    # b_2 (invariant)
                ],
                out_specs=pl.BlockSpec((tr, L), lambda i: (i, 0)),
            ),
            **common,
        )(xk, ak, bk)

    return out.reshape(orig_shape)


def _reference(x, a_2, b_2, eps=1e-6):
    """Pure-JAX reference matching the PyTorch module (unbiased std, std+eps)."""
    mean = jnp.mean(x, axis=-1, keepdims=True)
    var = jnp.sum((x - mean) ** 2, axis=-1, keepdims=True) / (x.shape[-1] - 1)
    std = jnp.sqrt(var)
    return a_2 * (x - mean) / (std + eps) + b_2


if __name__ == "__main__":
    key = jax.random.PRNGKey(0)

    # --- small-D (packed) case, as used in OpticalFormer: (B, S, D) = (2, 8, 32)
    B, S, D = 2, 8, 32
    kx, ka, kb, k2 = jax.random.split(key, 4)
    x = jax.random.normal(kx, (B, S, D), jnp.float32)
    a_2 = 1.0 + 0.1 * jax.random.normal(ka, (D,), jnp.float32)
    b_2 = 0.1 * jax.random.normal(kb, (D,), jnp.float32)

    out = jax.block_until_ready(layer_norm(x, a_2, b_2, eps=1e-6))
    ref = _reference(x, a_2, b_2, eps=1e-6)
    assert out.shape == x.shape
    assert jnp.allclose(out, ref, atol=1e-5, rtol=1e-5), "packed path mismatch"

    # --- lane-dense (unpacked) case to exercise the other code path
    D2 = 256
    k2x, k2a, k2b = jax.random.split(k2, 3)
    x2 = jax.random.normal(k2x, (4, 16, D2), jnp.float32)
    a2 = 1.0 + 0.1 * jax.random.normal(k2a, (D2,), jnp.float32)
    b2 = 0.1 * jax.random.normal(k2b, (D2,), jnp.float32)

    out2 = jax.block_until_ready(layer_norm(x2, a2, b2, eps=1e-6))
    ref2 = _reference(x2, a2, b2, eps=1e-6)
    assert out2.shape == x2.shape
    assert jnp.allclose(out2, ref2, atol=1e-5, rtol=1e-5), "unpacked path mismatch"

    print("KERNEL_OK")
</pallas_src>

<mosaic_0001>
module attributes {stable_mosaic.version = 11 : i64} {
  func.func @_layernorm_packed_kernel(%arg0: i32, %arg1: memref<4x128xf32, #tpu.memory_space<vmem>>, %arg2: memref<1x128xf32, #tpu.memory_space<vmem>>, %arg3: memref<1x128xf32, #tpu.memory_space<vmem>>, %arg4: memref<128x128xf32, #tpu.memory_space<vmem>>, %arg5: memref<4x128xf32, #tpu.memory_space<vmem>>) attributes {dimension_semantics = [#tpu.dimension_semantics<parallel>], iteration_bounds = array<i64: 1>, scalar_prefetch = 0 : i64, scratch_operands = 0 : i64, tpu.core_type = #tpu.core_type<tc>, window_params = [{transform_indices = @transform_0, window_bounds = array<i64: 4, 128>}, {pipeline_mode = #tpu.pipeline_mode<synchronous>, transform_indices = @transform_1, window_bounds = array<i64: 1, 128>}, {pipeline_mode = #tpu.pipeline_mode<synchronous>, transform_indices = @transform_2, window_bounds = array<i64: 1, 128>}, {pipeline_mode = #tpu.pipeline_mode<synchronous>, transform_indices = @transform_3, window_bounds = array<i64: 128, 128>}, {transform_indices = @transform_4, window_bounds = array<i64: 4, 128>}]} {
    %c0 = arith.constant 0 : index
    %c0_0 = arith.constant 0 : index
    %0 = vector.load %arg1[%c0, %c0_0] : memref<4x128xf32, #tpu.memory_space<vmem>>, vector<4x128xf32>
    %c0_1 = arith.constant 0 : index
    %c0_2 = arith.constant 0 : index
    %1 = vector.load %arg4[%c0_1, %c0_2] : memref<128x128xf32, #tpu.memory_space<vmem>>, vector<128x128xf32>
    %cst = arith.constant dense<0.000000e+00> : vector<4x128xf32>
    %2 = tpu.matmul %0, %1, %cst {dimension_numbers = #tpu.dot_dimension_numbers<[1], [0], [0], [1], [0, 0, 1, 1], [], []>} : vector<4x128xf32>, vector<128x128xf32>, vector<4x128xf32> -> vector<4x128xf32>
    %3 = arith.mulf %0, %0 : vector<4x128xf32>
    %cst_3 = arith.constant dense<0.000000e+00> : vector<4x128xf32>
    %4 = tpu.matmul %3, %1, %cst_3 {dimension_numbers = #tpu.dot_dimension_numbers<[1], [0], [0], [1], [0, 0, 1, 1], [], []>} : vector<4x128xf32>, vector<128x128xf32>, vector<4x128xf32> -> vector<4x128xf32>
    %cst_4 = arith.constant 3.125000e-02 : f32
    %5 = vector.broadcast %cst_4 : f32 to vector<4x128xf32>
    %6 = arith.mulf %2, %5 : vector<4x128xf32>
    %7 = arith.mulf %2, %6 : vector<4x128xf32>
    %8 = arith.subf %4, %7 : vector<4x128xf32>
    %cst_5 = arith.constant 0.0322580636 : f32
    %9 = vector.broadcast %cst_5 : f32 to vector<4x128xf32>
    %10 = arith.mulf %8, %9 : vector<4x128xf32>
    %cst_6 = arith.constant 0.000000e+00 : f32
    %11 = vector.broadcast %cst_6 : f32 to vector<4x128xf32>
    %12 = arith.maximumf %10, %11 : vector<4x128xf32>
    %13 = math.sqrt %12 : vector<4x128xf32>
    %cst_7 = arith.constant 9.99999997E-7 : f32
    %14 = vector.broadcast %cst_7 : f32 to vector<4x128xf32>
    %15 = arith.addf %13, %14 : vector<4x128xf32>
    %16 = tpu.reciprocal %15 : vector<4x128xf32> -> vector<4x128xf32>
    %c0_8 = arith.constant 0 : index
    %c0_9 = arith.constant 0 : index
    %17 = vector.load %arg2[%c0_8, %c0_9] : memref<1x128xf32, #tpu.memory_space<vmem>>, vector<1x128xf32>
    %c0_10 = arith.constant 0 : index
    %c0_11 = arith.constant 0 : index
    %18 = vector.load %arg3[%c0_10, %c0_11] : memref<1x128xf32, #tpu.memory_space<vmem>>, vector<1x128xf32>
    %19 = arith.subf %0, %6 : vector<4x128xf32>
    %20 = arith.mulf %19, %16 : vector<4x128xf32>
    %21 = vector.broadcast %17 : vector<1x128xf32> to vector<4x128xf32>
    %22 = arith.mulf %21, %20 : vector<4x128xf32>
    %23 = vector.broadcast %18 : vector<1x128xf32> to vector<4x128xf32>
    %24 = arith.addf %22, %23 : vector<4x128xf32>
    %c0_12 = arith.constant 0 : index
    %c0_13 = arith.constant 0 : index
    %25 = vector.load %arg5[%c0_12, %c0_13] : memref<4x128xf32, #tpu.memory_space<vmem>>, vector<4x128xf32>
    tpu.vector_store %arg5[%c0_12, %c0_13], %24 {strides = array<i32>} : memref<4x128xf32, #tpu.memory_space<vmem>>, vector<4x128xf32>,
    return
  }
  func.func @transform_0(%arg0: i32) -> (i32, i32) {
    %c0_i32 = arith.constant 0 : i32
    %c0_i32_0 = arith.constant 0 : i32
    return %arg0, %c0_i32 : i32, i32
  }
  func.func @transform_1(%arg0: i32) -> (i32, i32) {
    %c0_i32 = arith.constant 0 : i32
    %c0_i32_0 = arith.constant 0 : i32
    %c0_i32_1 = arith.constant 0 : i32
    return %c0_i32, %c0_i32_0 : i32, i32
  }
  func.func @transform_2(%arg0: i32) -> (i32, i32) {
    %c0_i32 = arith.constant 0 : i32
    %c0_i32_0 = arith.constant 0 : i32
    %c0_i32_1 = arith.constant 0 : i32
    return %c0_i32, %c0_i32_0 : i32, i32
  }
  func.func @transform_3(%arg0: i32) -> (i32, i32) {
    %c0_i32 = arith.constant 0 : i32
    %c0_i32_0 = arith.constant 0 : i32
    %c0_i32_1 = arith.constant 0 : i32
    return %c0_i32, %c0_i32_0 : i32, i32
  }
  func.func @transform_4(%arg0: i32) -> (i32, i32) {
    %c0_i32 = arith.constant 0 : i32
    %c0_i32_0 = arith.constant 0 : i32
    return %arg0, %c0_i32 : i32, i32
  }
}

</mosaic_0001>

<bundles_post_ra>
// kernel: tpu_custom_call.1
= control target key start
LH: loop header
LB: loop body
LE: loop exit
PB: predicated region body
PF: predicated region fallthrough
CT: control target
= control target key end

     0   :  { %9 = vsyncpa [#allocation3], 0  ;;  %s571_s0 = inlined_call_operand.hbm [shape: f32[4,128], index: 0, kind: input, shape index: {}]   ;;  %s572_s1 = inlined_call_operand.vmem [shape: f32[1,128], index: 1, kind: input, shape index: {}]   ;;  %s573_s2 = inlined_call_operand.vmem [shape: f32[1,128], index: 2, kind: input, shape index: {}]   ;;  %s574_s3 = inlined_call_operand.hbm [shape: f32[128,128], index: 3, kind: input, shape index: {}]   ;;  %s575_s4 = inlined_call_operand.hbm [shape: f32[4,128], index: 4, kind: output, shape index: {}]  }
   0x1   :  { %10 = vsyncpa [#allocation6], 0 }
   0x2   :  { %11 = vsyncpa [#allocation4], 0  ;;  %s489_s15 = smov [#allocation2]   ;;  %s490_s17 = smov [#allocation5]  }
   0x3   :  { %s18_s16 = sshll.u32 %s489_s15, 4  ;;  %s31_s18 = sshll.u32 %s490_s17, 4  ;;  %s19_s16 = int_to_ptr.vmem [resolvable:$true] %s18_s16  ;;  %s522_s18 = int_to_ptr.vmem [resolvable:$true] %s31_s18 }
   0x4   :  { %s417_s21 = scalar_lea.hbm %s571_s0, 64 }
   0x5   :  { %p418_p0 = scmp.ne.s32.totalorder %s571_s0, %s417_s21  ;;  %p421_p1 = scmp.lt.u32.totalorder %s417_s21, %s571_s0 }
   0x7   :  { %p423_p2 = pnand %p421_p1, %p418_p0 }
   0x9   :  { %426 = shalt.err (!%p423_p2)
}
   0xa   :  { %s427_s26 = scalar_lea.vmem %s19_s16, 64  ;;  %p432_p4 = scmp.lt.s32.totalorder %s19_s16, %s19_s16 }
   0xb   :  { %p428_p3 = scmp.ne.s32.totalorder %s19_s16, %s427_s26  ;;  %p433_p5 = scmp.lt.s32.totalorder %s427_s26, %s427_s26 }
   0xd   :  { %p434_p6 = por %p433_p5, %p432_p4 }
   0xf   :  { %p435_p7 = pnand %p434_p6, %p428_p3 }
  0x11   :  { %438 = shalt.err (!%p435_p7)
}
  0x12   :  { %21 = dma.hbm_to_vmem [thread:$0]  %s571_s0, 64, %s19_s16, [#allocation3]  }
  0x13   :  { %s439_s5 = scalar_lea.hbm %s574_s3, 2048 }
  0x14   :  { %p440_p8 = scmp.ne.s32.totalorder %s574_s3, %s439_s5  ;;  %p443_p9 = scmp.lt.u32.totalorder %s439_s5, %s574_s3 }
  0x16   :  { %p445_p10 = pnand %p443_p9, %p440_p8 }
  0x18   :  { %448 = shalt.err (!%p445_p10)
}
  0x19   :  { %s449_s10 = scalar_lea.vmem %s522_s18, 2048  ;;  %p454_p12 = scmp.lt.s32.totalorder %s522_s18, %s522_s18 }
  0x1a   :  { %p450_p11 = scmp.ne.s32.totalorder %s522_s18, %s449_s10  ;;  %p455_p13 = scmp.lt.s32.totalorder %s449_s10, %s449_s10 }
  0x1c   :  { %p456_p0 = por %p455_p13, %p454_p12 }
  0x1e   :  { %p457_p1 = pnand %p456_p0, %p450_p11 }
  0x20   :  { %460 = shalt.err (!%p457_p1)
}
  0x21   :  { %s491_s0 = smov 128   ;;  %s492_s11 = smov 8  }
  0x22   :  { %37 = dma.hbm_to_vmem [thread:$0]  %s574_s3, 2048, %s522_s18, [#allocation6], %s491_s0, %s491_s0, %s492_s11  }
  0x23   :  { %483 = dma.done.wait [#allocation3], 64  }
  0x24   :  { %484 = vsyncadd [#allocation3], 4294967232 }
  0x25   :  { %485 = dma.done.wait [#allocation6], 2048  }
  0x26   :  { %486 = vsyncadd [#allocation6], 4294965248  ;;  %v493_v0 = vmov 0.0|0.0   ;;  %vm494_vm0 = vmmov 0   ;;  %v495_v1 = vmov 0.0   ;;  %v45_v2 = vld [vmem:[#allocation5] sm:$0xff] }
  0x27   :  { %357 = vmatprep.subr.bf16.mxu0 %v493_v0  ;;  %381 = vmatprep.subr.bf16.mxu1 %v493_v0  ;;  %v46_v3 = vld [vmem:[#allocation5 + $0x8] sm:$0xff]  ;;  %v47_v4 = vld [vmem:[#allocation5 + $0x10] sm:$0xff]  ;;  %v48_v6 = vld [vmem:[#allocation5 + $0x18] sm:$0xff]  ;;  %s496_s17 = smov [#allocation7]  }
  0x28   :  { %319 = vmatprep.mubr.msk.f32.mxu0 %vm494_vm0, %v495_v1  ;;  %354 = vmatprep.mubr.msk.f32.mxu1 %vm494_vm0, %v495_v1  ;;  %v358_v5 = vpack.c.bf16 %v46_v3, %v45_v2  ;;  %v361_v7 = vpack.c.bf16 %v48_v6, %v47_v4  ;;  %v49_v8 = vld [vmem:[#allocation5 + $0x20] sm:$0xff]  ;;  %v50_v9 = vld [vmem:[#allocation5 + $0x28] sm:$0xff]  ;;  %v51_v11 = vld [vmem:[#allocation5 + $0x30] sm:$0xff]  ;;  %s241_s18 = sshll.u32 %s496_s17, 4  ;;  %s242_s18 = int_to_ptr.vmem [resolvable:$true] %s241_s18 }
  0x29   :  { %v364_v10 = vpack.c.bf16 %v50_v9, %v49_v8  ;;  %v52_v12 = vld [vmem:[#allocation5 + $0x38] sm:$0xff]  ;;  %v53_v14 = vld [vmem:[#allocation5 + $0x40] sm:$0xff]  ;;  %v54_v15 = vld [vmem:[#allocation5 + $0x48] sm:$0xff]  ;;  %s461_s19 = scalar_lea.vmem %s242_s18, 64  ;;  %p466_p3 = scmp.lt.s32.totalorder %s242_s18, %s242_s18 }
  0x2a   :  { %359 = vmatpush3.bf16.msra.mxu0 %v358_v5  ;;  %383 = vmatpush3.bf16.msra.mxu1 %v358_v5  ;;  %v367_v13 = vpack.c.bf16 %v52_v12, %v51_v11  ;;  %v370_v16 = vpack.c.bf16 %v54_v15, %v53_v14  ;;  %v55_v17 = vld [vmem:[#allocation5 + $0x50] sm:$0xff]  ;;  %v56_v18 = vld [vmem:[#allocation5 + $0x58] sm:$0xff]  ;;  %v57_v20 = vld [vmem:[#allocation5 + $0x60] sm:$0xff]  ;;  %p462_p2 = scmp.ne.s32.totalorder %s242_s18, %s461_s19  ;;  %p467_p4 = scmp.lt.s32.totalorder %s461_s19, %s461_s19 }
  0x2b   :  { %360 = vmatprep.subr.bf16.mxu0 %v493_v0  ;;  %384 = vmatprep.subr.bf16.mxu1 %v493_v0  ;;  %v373_v19 = vpack.c.bf16 %v56_v18, %v55_v17  ;;  %v58_v21 = vld [vmem:[#allocation5 + $0x68] sm:$0xff]  ;;  %v59_v23 = vld [vmem:[#allocation5 + $0x70] sm:$0xff]  ;;  %v60_v24 = vld [vmem:[#allocation5 + $0x78] sm:$0xff] }
  0x2c   :  { %v376_v22 = vpack.c.bf16 %v58_v21, %v57_v20  ;;  %v379_v25 = vpack.c.bf16 %v60_v24, %v59_v23  ;;  %v44_v26 = vld [vmem:[#allocation2] sm:$0xf]  ;;  %p468_p5 = por %p467_p4, %p466_p3 }
  0x2d   :  { %v131_v27 = vmul.f32 %v44_v26, %v44_v26  ;;  %v251_v45 = vld [vmem:[%s572_s1] ss:$0 sm:$0xff] }
  0x2e   :  { %362 = vmatpush3.bf16.msra.mxu0 %v361_v7  ;;  %386 = vmatpush3.bf16.msra.mxu1 %v361_v7  ;;  %v252_v47 = vld [vmem:[%s573_s2] ss:$0 sm:$0xff]  ;;  %p469_p6 = pnand %p468_p5, %p462_p2 }
  0x2f   :  { %363 = vmatprep.subr.bf16.mxu0 %v493_v0  ;;  %387 = vmatprep.subr.bf16.mxu1 %v493_v0 }
  0x32   :  { %365 = vmatpush3.bf16.msra.mxu0 %v364_v10  ;;  %389 = vmatpush3.bf16.msra.mxu1 %v364_v10 }
  0x33   :  { %366 = vmatprep.subr.bf16.mxu0 %v493_v0  ;;  %390 = vmatprep.subr.bf16.mxu1 %v493_v0 }
  0x36   :  { %368 = vmatpush3.bf16.msra.mxu0 %v367_v13  ;;  %392 = vmatpush3.bf16.msra.mxu1 %v367_v13 }
  0x37   :  { %369 = vmatprep.subr.bf16.mxu0 %v493_v0  ;;  %393 = vmatprep.subr.bf16.mxu1 %v493_v0 }
  0x3a   :  { %371 = vmatpush3.bf16.msra.mxu0 %v370_v16  ;;  %395 = vmatpush3.bf16.msra.mxu1 %v370_v16 }
  0x3b   :  { %372 = vmatprep.subr.bf16.mxu0 %v493_v0  ;;  %396 = vmatprep.subr.bf16.mxu1 %v493_v0 }
  0x3e   :  { %374 = vmatpush3.bf16.msra.mxu0 %v373_v19  ;;  %398 = vmatpush3.bf16.msra.mxu1 %v373_v19 }
  0x3f   :  { %375 = vmatprep.subr.bf16.mxu0 %v493_v0  ;;  %399 = vmatprep.subr.bf16.mxu1 %v493_v0 }
  0x42   :  { %377 = vmatpush3.bf16.msra.mxu0 %v376_v22  ;;  %401 = vmatpush3.bf16.msra.mxu1 %v376_v22 }
  0x43   :  { %378 = vmatprep.subr.bf16.mxu0 %v493_v0  ;;  %402 = vmatprep.subr.bf16.mxu1 %v493_v0 }
  0x46   :  { %380 = vmatpush3.bf16.msra.mxu0 %v379_v25  ;;  %404 = vmatpush3.bf16.msra.mxu1 %v379_v25 }
  0x49   :  { %320 = vmatmul.mubr.f32.vlgmr.msra.gmra.mrb[0].mxu0 %v44_v26  ;;  %355 = vmatmul.mubr.f32.vlgmr.msra.gmra.mrb[0].mxu1 %v131_v27 }
 0x11c   :  { %v127_v28 = vpop.f32.mrb[0].mxu0  ;;  %v198_v29 = vpop.f32.mrb[0].mxu1 }
 0x11d   :  { %v202_v30 = vmul.f32 0.03125, %v127_v28  ;;  %v321_v31 = vpop.f32.mrb[1].mxu0  ;;  %v356_v32 = vpop.f32.mrb[1].mxu1 }
 0x11f   :  { %v203_v33 = vmul.f32 %v202_v30, %v127_v28  ;;  %v218_v43 = vsub.f32 %v44_v26, %v202_v30 }
 0x121   :  { %v204_v34 = vsub.f32 %v198_v29, %v203_v33 }
 0x123   :  { %v205_v35 = vmul.f32 0.032258064, %v204_v34 }
 0x125   :  { %v206_v36 = vmax.f32 %v205_v35, 0.0 }
 0x127   :  { %413 = vrsqrt.f32 %v206_v36  ;;  %vm209_vm1 = vcmp.eq.f32.partialorder %v206_v36, inf  ;;  %v212_v39 = vand.u32 2147483648, %v206_v36  ;;  %vm211_vm2 = vcmp.eq.f32.partialorder %v206_v36, 0.0 }
 0x131   :  { %v414_v37 = vpop.eup %413 }
 0x132   :  { %v208_v38 = vmul.f32 %v414_v37, %v206_v36 }
 0x134   :  { %v210_v40 = vsel %vm209_vm1, %v206_v36, %v208_v38 }
 0x135   :  { %v213_v41 = vsel %vm211_vm2, %v212_v39, %v210_v40 }
 0x136   :  { %v214_v42 = vadd.f32 1e-06, %v213_v41 }
 0x138   :  { %415 = vrcp.f32 %v214_v42 }
 0x142   :  { %v416_v44 = vpop.eup %415 }
 0x143   :  { %v219_v46 = vmul.f32 %v416_v44, %v218_v43 }
 0x145   :  { %v226_v48 = vmul.f32 %v251_v45, %v219_v46 }
 0x147   :  { %v233_v49 = vadd.f32 %v252_v47, %v226_v48 }
 0x149   :  { %234 = vst [vmem:[#allocation7] sm:$0xf] %v233_v49 }
 0x14a   :  { %472 = shalt.err (!%p469_p6)
}
 0x14b   :  { %s473_s21 = scalar_lea.hbm %s575_s4, 64 }
 0x14c   :  { %p474_p7 = scmp.ne.s32.totalorder %s575_s4, %s473_s21  ;;  %p477_p8 = scmp.lt.u32.totalorder %s473_s21, %s575_s4 }
 0x14e   :  { %p479_p9 = pnand %p477_p8, %p474_p7 }
 0x150   :  { %482 = shalt.err (!%p479_p9)
}
 0x151   :  { %244 = dma.vmem_to_hbm [thread:$0]  %s242_s18, 64, %s575_s4, [#allocation4]  }
 0x152   :  { %487 = dma.done.wait [#allocation4], 64  }
 0x153   :  { %488 = vsyncadd [#allocation4], 4294967232 }
 0x154   :  { %248 = vsyncpa [#allocation3], 1 }
 0x155   :  { %249 = vsyncpa [#allocation6], 1 }
 0x156   :  { %250 = vsyncpa [#allocation4], 1 }

</bundles_post_ra>
